<compile_context>
chip_gen: v6e
topology: v6e:2x2x1
jax: 0.10.0
libtpu: 0.0.40
codegen_flags: <defaults>
</compile_context>

<pallas_src>
import functools

import jax
import jax.numpy as jnp
from jax.experimental import pallas as pl
from jax.experimental.pallas import tpu as pltpu


def _cdiv(a: int, b: int) -> int:
    return -(-a // b)


def _round_up(x: int, m: int) -> int:
    return _cdiv(x, m) * m


def _choose_tile(dim: int, target: int, align: int):
    """Tile derived from the problem: padding stays small (no double rounding)."""
    n_tiles = _cdiv(dim, target)
    tile = _round_up(_cdiv(dim, n_tiles), align)
    return tile, n_tiles * tile  # (tile, padded extent = n_tiles * tile)


def _vmem_limit_bytes(tm: int, tn: int, tk: int) -> int:
    # Double-buffered bf16 x/w tiles + bias + double-buffered f32 output tile.
    need = 2 * (tm * tk * 2) + 2 * (tk * tn * 2) + 2 * (tn * 4) + 2 * (tm * tn * 4)
    # Leave generous headroom but never exceed ~48 MiB (v7x has 64 MiB VMEM).
    return int(min(max(2 * need, 32 * 1024 * 1024), 48 * 1024 * 1024))


def _linear_relu_kernel(x_ref, w_ref, b_ref, o_ref):
    """One (tm, tn) output tile; K is the last ('arbitrary') grid axis.

    The output block index is constant along K, so o_ref stays resident in
    VMEM across the reduction and doubles as the f32 accumulator.
    """
    k = pl.program_id(2)

    @pl.when(k == 0)
    def _():
        o_ref[...] = jnp.zeros_like(o_ref)

    # x_ref: (tm, tk) bf16; w_ref: (tk, tn) bf16 (pre-transposed [in, out]).
    o_ref[...] += jnp.dot(x_ref[...], w_ref[...],
                          preferred_element_type=jnp.float32)

    @pl.when(k == pl.num_programs(2) - 1)
    def _():
        # Bias + ReLU once, in f32, on the final K step.
        o_ref[...] = jnp.maximum(o_ref[...] + b_ref[...], 0.0)


def prepare_linear_params(weight, bias, *, tn_target=512, tk_target=1024):
    """One-time parameter prep (amortized across forward calls).

    weight: [out_features, in_features] (PyTorch nn.Linear layout)
    bias:   [out_features]
    Returns (w_t_padded [Kp, Np] bf16, bias_padded [1, Np] f32, meta dict).
    """
    N, K = weight.shape
    assert bias.shape == (N,)
    tn, Np = _choose_tile(N, tn_target, 128)
    tk, Kp = _choose_tile(K, tk_target, 128)
    # Transpose to [K, N] once (plain MXU matmul in-kernel, no vxpose), cast
    # to bf16 once, pad once.  Zero K-padding contributes nothing to the sum.
    w_t = jnp.pad(weight.T.astype(jnp.bfloat16), ((0, Kp - K), (0, Np - N)))
    b_p = jnp.pad(bias.astype(jnp.float32), (0, Np - N)).reshape(1, Np)
    meta = dict(n=N, k=K, tn=tn, tk=tk)
    return w_t, b_p, meta


@functools.partial(jax.jit, static_argnames=("n", "k", "tn", "tk", "tm_target"))
def basic_block_forward(x, w_t, b_p, *, n, k, tn, tk, tm_target=512):
    """Pallas equivalent of BasicBlock.forward on prepared parameters.

    x:   [batch, in_features] float32
    w_t: [Kp, Np] bf16 (from prepare_linear_params)
    b_p: [1, Np] float32
    returns [batch, out_features] float32
    """
    M, Kx = x.shape
    assert Kx == k
    Kp, Np = w_t.shape

    tm, Mp = _choose_tile(M, tm_target, 16)   # bf16 sublane packing: 16-aligned
    grid_m, grid_n, grid_k = Mp // tm, Np // tn, Kp // tk

    # v7x: make sure both TensorCores get work when the output grid collapses
    # to a single tile (the 2 TCs are sharded over the "parallel" axes).
    if grid_m * grid_n == 1:
        if Np % 256 == 0:           # split N: keeps tn a multiple of 128
            tn = Np // 2
            grid_n = 2
        elif Mp % 32 == 0:          # else split M: keeps tm a multiple of 16
            tm = Mp // 2
            grid_m = 2

    # Per-call activation cast+pad (cheap relative to the weight; zero padding
    # along K is harmless, padded M rows are sliced off below).
    x_p = jnp.pad(x.astype(jnp.bfloat16), ((0, Mp - M), (0, Kp - k)))

    grid = (grid_m, grid_n, grid_k)

    out = pl.pallas_call(
        _linear_relu_kernel,
        out_shape=jax.ShapeDtypeStruct((Mp, Np), jnp.float32),
        grid=grid,
        in_specs=[
            pl.BlockSpec((tm, tk), lambda i, j, kk: (i, kk)),  # x tile
            pl.BlockSpec((tk, tn), lambda i, j, kk: (kk, j)),  # weight tile [K, N]
            pl.BlockSpec((1, tn), lambda i, j, kk: (0, j)),    # bias (N-indexed)
        ],
        out_specs=pl.BlockSpec((tm, tn), lambda i, j, kk: (i, j)),
        compiler_params=pltpu.CompilerParams(
            dimension_semantics=("parallel", "parallel", "arbitrary"),
            vmem_limit_bytes=_vmem_limit_bytes(tm, tn, tk),
        ),
    )(x_p, w_t, b_p)

    return out[:M, :n]


def basic_block_apply(x, weight, bias):
    """Convenience: prepare + forward in one call (prep not amortized)."""
    w_t, b_p, meta = prepare_linear_params(weight, bias)
    return basic_block_forward(x, w_t, b_p, **meta)


def _ref(x, weight, bias):
    return jnp.maximum(x @ weight.T + bias, 0.0)


if __name__ == "__main__":
    key = jax.random.PRNGKey(0)

    # --- Small shapes consistent with BasicBlock(in_channels, out_channels) ---
    batch, in_channels, out_channels = 8, 32, 64
    kx, kw, kb = jax.random.split(key, 3)
    bound = 1.0 / (in_channels ** 0.5)
    x = jax.random.normal(kx, (batch, in_channels), dtype=jnp.float32)
    weight = jax.random.uniform(kw, (out_channels, in_channels),
                                minval=-bound, maxval=bound, dtype=jnp.float32)
    bias = jax.random.uniform(kb, (out_channels,),
                              minval=-bound, maxval=bound, dtype=jnp.float32)

    w_t, b_p, meta = prepare_linear_params(weight, bias)   # one-time prep
    out = basic_block_forward(x, w_t, b_p, **meta)
    jax.block_until_ready(out)
    assert out.shape == (batch, out_channels)
    # bf16 matmul w/ f32 accumulate vs f32 reference -> loosened tolerance.
    assert jnp.allclose(out, _ref(x, weight, bias), atol=2e-2, rtol=2e-2)

    # --- Second check: padding (N=200), multi-step K reduction (K=1536 -> 2
    #     steps of tk=768 with zero waste), and the single-output-tile split.
    b2, in2, out2 = 40, 1536, 200
    kx2, kw2, kb2 = jax.random.split(jax.random.PRNGKey(1), 3)
    bound2 = 1.0 / (in2 ** 0.5)
    x2 = jax.random.normal(kx2, (b2, in2), dtype=jnp.float32)
    w2 = jax.random.uniform(kw2, (out2, in2), minval=-bound2, maxval=bound2,
                            dtype=jnp.float32)
    bi2 = jax.random.uniform(kb2, (out2,), minval=-bound2, maxval=bound2,
                             dtype=jnp.float32)
    w2_t, b2_p, meta2 = prepare_linear_params(w2, bi2)
    out_2 = basic_block_forward(x2, w2_t, b2_p, **meta2)
    jax.block_until_ready(out_2)
    assert out_2.shape == (b2, out2)
    assert jnp.allclose(out_2, _ref(x2, w2, bi2), atol=3e-2, rtol=3e-2)

    print("KERNEL_OK")
</pallas_src>

<mosaic_0001>
module attributes {stable_mosaic.version = 11 : i64} {
  func.func @_linear_relu_kernel(%arg0: i32, %arg1: i32, %arg2: i32, %arg3: memref<16x128xbf16, #tpu.memory_space<vmem>>, %arg4: memref<128x128xbf16, #tpu.memory_space<vmem>>, %arg5: memref<1x128xf32, #tpu.memory_space<vmem>>, %arg6: memref<16x128xf32, #tpu.memory_space<vmem>>) attributes {dimension_semantics = [#tpu.dimension_semantics<parallel>, #tpu.dimension_semantics<parallel>, #tpu.dimension_semantics<arbitrary>], iteration_bounds = array<i64: 1, 1, 1>, scalar_prefetch = 0 : i64, scratch_operands = 0 : i64, tpu.core_type = #tpu.core_type<tc>, window_params = [{transform_indices = @transform_0, window_bounds = array<i64: 16, 128>}, {transform_indices = @transform_1, window_bounds = array<i64: 128, 128>}, {transform_indices = @transform_2, window_bounds = array<i64: 1, 128>}, {transform_indices = @transform_3, window_bounds = array<i64: 16, 128>}]} {
    %c0_i32 = arith.constant 0 : i32
    %0 = arith.cmpi eq, %arg2, %c0_i32 : i32
    %1 = arith.extui %0 : i1 to i32
    %c0_i32_0 = arith.constant 0 : i32
    %2 = arith.cmpi ne, %1, %c0_i32_0 : i32
    scf.if %2 {
      %cst_10 = arith.constant 0.000000e+00 : f32
      %12 = vector.broadcast %cst_10 : f32 to vector<16x128xf32>
      %c0_11 = arith.constant 0 : index
      %c0_12 = arith.constant 0 : index
      %13 = vector.load %arg6[%c0_11, %c0_12] : memref<16x128xf32, #tpu.memory_space<vmem>>, vector<16x128xf32>
      tpu.vector_store %arg6[%c0_11, %c0_12], %12 {strides = array<i32>} : memref<16x128xf32, #tpu.memory_space<vmem>>, vector<16x128xf32>,
    } else {
    }
    %c0 = arith.constant 0 : index
    %c0_1 = arith.constant 0 : index
    %3 = vector.load %arg6[%c0, %c0_1] : memref<16x128xf32, #tpu.memory_space<vmem>>, vector<16x128xf32>
    %c0_2 = arith.constant 0 : index
    %c0_3 = arith.constant 0 : index
    %4 = vector.load %arg3[%c0_2, %c0_3] : memref<16x128xbf16, #tpu.memory_space<vmem>>, vector<16x128xbf16>
    %c0_4 = arith.constant 0 : index
    %c0_5 = arith.constant 0 : index
    %5 = vector.load %arg4[%c0_4, %c0_5] : memref<128x128xbf16, #tpu.memory_space<vmem>>, vector<128x128xbf16>
    %cst = arith.constant dense<0.000000e+00> : vector<16x128xf32>
    %6 = tpu.matmul %4, %5, %cst {dimension_numbers = #tpu.dot_dimension_numbers<[1], [0], [0], [1], [0, 0, 1, 1], [], []>} : vector<16x128xbf16>, vector<128x128xbf16>, vector<16x128xf32> -> vector<16x128xf32>
    %7 = arith.addf %3, %6 : vector<16x128xf32>
    %c0_6 = arith.constant 0 : index
    %c0_7 = arith.constant 0 : index
    %8 = vector.load %arg6[%c0_6, %c0_7] : memref<16x128xf32, #tpu.memory_space<vmem>>, vector<16x128xf32>
    tpu.vector_store %arg6[%c0_6, %c0_7], %7 {strides = array<i32>} : memref<16x128xf32, #tpu.memory_space<vmem>>, vector<16x128xf32>,
    %c0_i32_8 = arith.constant 0 : i32
    %9 = arith.cmpi eq, %arg2, %c0_i32_8 : i32
    %10 = arith.extui %9 : i1 to i32
    %c0_i32_9 = arith.constant 0 : i32
    %11 = arith.cmpi ne, %10, %c0_i32_9 : i32
    scf.if %11 {
      %c0_10 = arith.constant 0 : index
      %c0_11 = arith.constant 0 : index
      %12 = vector.load %arg6[%c0_10, %c0_11] : memref<16x128xf32, #tpu.memory_space<vmem>>, vector<16x128xf32>
      %c0_12 = arith.constant 0 : index
      %c0_13 = arith.constant 0 : index
      %13 = vector.load %arg5[%c0_12, %c0_13] : memref<1x128xf32, #tpu.memory_space<vmem>>, vector<1x128xf32>
      %14 = vector.broadcast %13 : vector<1x128xf32> to vector<16x128xf32>
      %15 = arith.addf %12, %14 : vector<16x128xf32>
      %cst_14 = arith.constant 0.000000e+00 : f32
      %16 = vector.broadcast %cst_14 : f32 to vector<16x128xf32>
      %17 = arith.maximumf %15, %16 : vector<16x128xf32>
      %c0_15 = arith.constant 0 : index
      %c0_16 = arith.constant 0 : index
      %18 = vector.load %arg6[%c0_15, %c0_16] : memref<16x128xf32, #tpu.memory_space<vmem>>, vector<16x128xf32>
      tpu.vector_store %arg6[%c0_15, %c0_16], %17 {strides = array<i32>} : memref<16x128xf32, #tpu.memory_space<vmem>>, vector<16x128xf32>,
    } else {
    }
    return
  }
  func.func @transform_0(%arg0: i32, %arg1: i32, %arg2: i32) -> (i32, i32) {
    %c0_i32 = arith.constant 0 : i32
    return %arg0, %arg2 : i32, i32
  }
  func.func @transform_1(%arg0: i32, %arg1: i32, %arg2: i32) -> (i32, i32) {
    %c0_i32 = arith.constant 0 : i32
    return %arg2, %arg1 : i32, i32
  }
  func.func @transform_2(%arg0: i32, %arg1: i32, %arg2: i32) -> (i32, i32) {
    %c0_i32 = arith.constant 0 : i32
    %c0_i32_0 = arith.constant 0 : i32
    return %c0_i32, %arg1 : i32, i32
  }
  func.func @transform_3(%arg0: i32, %arg1: i32, %arg2: i32) -> (i32, i32) {
    %c0_i32 = arith.constant 0 : i32
    return %arg0, %arg1 : i32, i32
  }
}

</mosaic_0001>

<bundles_post_ra>
// kernel: basic_block_forward.1
= control target key start
LH: loop header
LB: loop body
LE: loop exit
PB: predicated region body
PF: predicated region fallthrough
CT: control target
= control target key end

     0   :  { %8 = vsyncpa [#allocation3], 0  ;;  %s252_s12 = smov [#allocation2]   ;;  %s292_s0 = inlined_call_operand.vmem [shape: bf16[16,128], index: 0, kind: input, shape index: {}]   ;;  %s293_s1 = inlined_call_operand.hbm [shape: bf16[128,128], index: 1, kind: input, shape index: {}]   ;;  %s294_s2 = inlined_call_operand.vmem [shape: f32[1,128], index: 2, kind: input, shape index: {}]   ;;  %s295_s3 = inlined_call_operand.vmem [shape: f32[16,128], index: 3, kind: output, shape index: {}]  }
   0x1   :  { %s16_s13 = sshll.u32 %s252_s12, 4  ;;  %s17_s13 = int_to_ptr.vmem [resolvable:$true] %s16_s13 }
   0x2   :  { %s238_s14 = scalar_lea.vmem %s17_s13, 1024  ;;  %p243_p1 = scmp.lt.s32.totalorder %s17_s13, %s17_s13 }
   0x3   :  { %p239_p0 = scmp.ne.s32.totalorder %s17_s13, %s238_s14  ;;  %p244_p2 = scmp.lt.s32.totalorder %s238_s14, %s238_s14 }
   0x5   :  { %p245_p3 = por %p244_p2, %p243_p1 }
   0x7   :  { %p246_p4 = pnand %p245_p3, %p239_p0 }
   0x9   :  { %249 = shalt.err (!%p246_p4)
}
   0xa   :  { %s253_s15 = smov 64   ;;  %s254_s16 = smov 4  }
   0xb   :  { %22 = dma.hbm_to_vmem [thread:$0]  %s293_s1, 1024, %s17_s13, [#allocation3], %s253_s15, %s253_s15, %s254_s16  }
   0xc   :  { %250 = dma.done.wait [#allocation3], 1024  }
   0xd   :  { %251 = vsyncadd [#allocation3], 4294966272  ;;  %v255_v0 = vmov 0.0   ;;  %vm256_vm0 = vmmov 0   ;;  %v221_v1 = vld [vmem:[#allocation2 + $0x38] sm:$0xff]   ;;  %v222_v2 = vld [vmem:[#allocation2 + $0x30] sm:$0xff]  }
   0xe   :  { %196 = vmatprep.subr.bf16.mxu0 %v255_v0  ;;  %212 = vmatprep.mubr.msk.bf16.mxu0 %vm256_vm0, %v255_v0  ;;  %v223_v3 = vld [vmem:[#allocation2 + $0x28] sm:$0xff]   ;;  %v224_v4 = vld [vmem:[#allocation2 + $0x20] sm:$0xff]   ;;  %v225_v5 = vld [vmem:[#allocation2 + $0x18] sm:$0xff]  }
   0xf   :  { %197 = vmatpush3.bf16.msra.mxu0 %v221_v1  ;;  %v226_v6 = vld [vmem:[#allocation2 + $0x10] sm:$0xff]   ;;  %v227_v7 = vld [vmem:[#allocation2 + $0x8] sm:$0xff]   ;;  %v228_v8 = vld [vmem:[#allocation2] sm:$0xff]  }
  0x10   :  { %198 = vmatprep.subr.bf16.mxu0 %v255_v0  ;;  %v229_v9 = vld [vmem:[%s292_s0] sm:$0xff]  }
  0x11   :  { %v186_v11 = vld [vmem:[%s294_s2] ss:$0 sm:$0xff] }
  0x13   :  { %199 = vmatpush3.bf16.msra.mxu0 %v222_v2 }
  0x14   :  { %200 = vmatprep.subr.bf16.mxu0 %v255_v0 }
  0x17   :  { %201 = vmatpush3.bf16.msra.mxu0 %v223_v3 }
  0x18   :  { %202 = vmatprep.subr.bf16.mxu0 %v255_v0 }
  0x1b   :  { %203 = vmatpush3.bf16.msra.mxu0 %v224_v4 }
  0x1c   :  { %204 = vmatprep.subr.bf16.mxu0 %v255_v0 }
  0x1f   :  { %205 = vmatpush3.bf16.msra.mxu0 %v225_v5 }
  0x20   :  { %206 = vmatprep.subr.bf16.mxu0 %v255_v0 }
  0x23   :  { %207 = vmatpush3.bf16.msra.mxu0 %v226_v6 }
  0x24   :  { %208 = vmatprep.subr.bf16.mxu0 %v255_v0 }
  0x27   :  { %209 = vmatpush3.bf16.msra.mxu0 %v227_v7 }
  0x28   :  { %210 = vmatprep.subr.bf16.mxu0 %v255_v0 }
  0x2b   :  { %211 = vmatpush3.bf16.msra.mxu0 %v228_v8 }
  0x2e   :  { %213 = vmatmul.mubr.bf16.vlgmr.msra.gmra.mxu0 %v229_v9 }
  0xee   :  { %v143_v10 = vpop.f32.mrf.mxu0 }
  0xef   :  { %v166_v13 = vadd.f32 %v186_v11, %v143_v10 }
  0xf0   :  { %v214_v12 = vpop.f32.mrf.mxu0 }
  0xf1   :  { %v168_v15 = vmax.f32 %v166_v13, 0.0 }
  0xf2   :  { %v146_v14 = vpop.f32.mrf.mxu0 }
  0xf3   :  { %170 = vst [vmem:[%s295_s3] sm:$0xff] %v168_v15  ;;  %v167_v17 = vadd.f32 %v186_v11, %v146_v14 }
  0xf4   :  { %v215_v16 = vpop.f32.mrf.mxu0 }
  0xf5   :  { %v169_v18 = vmax.f32 %v167_v17, 0.0 }
  0xf7   :  { %171 = vst [vmem:[%s295_s3 + $0x8] sm:$0xff] %v169_v18 }
  0xf8   :  { %176 = vsyncpa [#allocation3], 1 }

</bundles_post_ra>
